<compile_context>
chip_gen: v7x
topology: tpu7x:2x2x1
jax: 0.10.0
libtpu: 0.0.40
codegen_flags: <defaults>
</compile_context>

<pallas_src>
import functools
import math

import jax
import jax.numpy as jnp
from jax import lax
from jax.experimental import pallas as pl
from jax.experimental.pallas import tpu as pltpu

_EPS = 1e-8            # F.cosine_similarity eps
_LOG2 = math.log(2.0)  # softplus(0): contribution of the masked-out entries


def _contrastive_loss2_kernel(zi_ref, zj_ref, out_ref, acc_ref, w2t_ref, *,
                              inv_tau, use_softplus, tb):
    r = pl.program_id(0)
    nb = pl.num_programs(0)
    B, D = zj_ref.shape

    @pl.when(r == 0)
    def _init():
        acc_ref[...] = jnp.zeros_like(acc_ref)
        zj = zj_ref[...].astype(jnp.float32)
        # Row vector of ||z_j||^2, computed on the MXU as (1,D) . (B,D)^T so we
        # never need a (B,1)->(1,B) relayout; done once and reused every step.
        ones_row = jnp.ones((1, D), jnp.float32)
        w2t_ref[...] = lax.dot_general(
            ones_row, zj * zj,
            dimension_numbers=(((1,), (1,)), ((), ())),
            preferred_element_type=jnp.float32)                   # (1, B)

    row0 = pl.multiple_of(r * tb, tb)
    zi_blk = zi_ref[pl.ds(row0, tb), :].astype(jnp.float32)       # (tb, D)
    zj_full = zj_ref[...].astype(jnp.float32)                     # (B, D)

    # --- negatives: cos(z_i[row block], z_j[all]) / tau -----------------------
    dots = lax.dot_general(
        zi_blk, zj_full,
        dimension_numbers=(((1,), (1,)), ((), ())),
        preferred_element_type=jnp.float32)                       # (tb, B)
    w1_blk = jnp.sum(zi_blk * zi_blk, axis=-1, keepdims=True)     # (tb, 1)
    # 1 / max(||zi||*||zj||, eps) == rsqrt(max(||zi||^2*||zj||^2, eps^2))
    inv_den = lax.rsqrt(jnp.maximum(w1_blk * w2t_ref[...], _EPS * _EPS))
    neg_sim = dots * inv_den * inv_tau                            # (tb, B)

    # torch.tril(..., diagonal=-1) mask for this row block (global row index).
    row = r * tb + lax.broadcasted_iota(jnp.int32, (tb, B), 0)
    col = lax.broadcasted_iota(jnp.int32, (tb, B), 1)
    tril = row > col

    if use_softplus:
        # Stable softplus; masked-out entries are zeros in the reference and
        # contribute softplus(0) = log(2) each.
        sp = jnp.maximum(neg_sim, 0.0) + jnp.log(1.0 + jnp.exp(-jnp.abs(neg_sim)))
        acc_ref[...] += jnp.sum(jnp.where(tril, sp, _LOG2), keepdims=True)

        @pl.when(r == nb - 1)
        def _finalize():
            # Positives need every row together with the global softplus sum,
            # so compute them once here from the resident (B, D) operands.
            zi = zi_ref[...].astype(jnp.float32)                  # (B, D)
            zj = zj_ref[...].astype(jnp.float32)                  # (B, D)
            w1 = jnp.sum(zi * zi, axis=-1, keepdims=True)         # (B, 1)
            w2 = jnp.sum(zj * zj, axis=-1, keepdims=True)         # (B, 1)
            pos_dot = jnp.sum(zi * zj, axis=-1, keepdims=True)    # (B, 1)
            pos_sim = (pos_dot
                       * lax.rsqrt(jnp.maximum(w1 * w2, _EPS * _EPS))
                       * inv_tau)                                 # (B, 1)
            exp_pos = jnp.exp(pos_sim)
            # neg_prob.mean(dim=1).sum(dim=-1) == (total softplus sum) / B
            s = acc_ref[...] * (1.0 / B)                          # (1, 1)
            loss_vec = -jnp.log(exp_pos / (exp_pos + s))          # (B, 1)
            loss11 = jnp.sum(loss_vec, keepdims=True) * (1.0 / B)
            out_ref[...] = jnp.broadcast_to(loss11, out_ref.shape)
    else:
        # Softmax branch: everything is per-row -> accumulate per-row losses.
        zj_blk = zj_ref[pl.ds(row0, tb), :].astype(jnp.float32)   # (tb, D)
        neg0 = jnp.where(tril, neg_sim, 0.0)                      # (tb, B)
        m = jnp.max(neg0, axis=1, keepdims=True)
        e = jnp.exp(neg0 - m)
        p = e / jnp.sum(e, axis=1, keepdims=True)                 # row softmax
        row_sum = jnp.sum(p, axis=1, keepdims=True)               # (tb, 1)

        w2_blk = jnp.sum(zj_blk * zj_blk, axis=-1, keepdims=True)
        pos_dot = jnp.sum(zi_blk * zj_blk, axis=-1, keepdims=True)
        pos_sim = (pos_dot
                   * lax.rsqrt(jnp.maximum(w1_blk * w2_blk, _EPS * _EPS))
                   * inv_tau)                                     # (tb, 1)
        exp_pos = jnp.exp(pos_sim)
        loss_vec = -jnp.log(exp_pos / (exp_pos + row_sum))        # (tb, 1)
        acc_ref[...] += jnp.sum(loss_vec, keepdims=True)

        @pl.when(r == nb - 1)
        def _finalize():
            loss11 = acc_ref[...] * (1.0 / B)
            out_ref[...] = jnp.broadcast_to(loss11, out_ref.shape)


def _pick_block_rows(B):
    # Keep the live (tb, B) f32 temporaries comfortably inside VMEM while still
    # giving the MXU a reasonably tall LHS tile.
    limit = max(8, (1 << 20) // max(B, 128))
    for cand in (512, 256, 128, 64, 32, 16, 8):
        if cand <= limit and B % cand == 0:
            return cand
    for cand in (512, 256, 128, 64, 32, 16, 8):
        if B % cand == 0:
            return cand
    return B  # odd batch: single full-size block (always a legal block shape)


def contrastive_loss2(z_i, z_j, *, tau=0.07, use_softplus=True):
    """Pallas TPU implementation of ContrastiveLoss2.forward.  z_i, z_j: (B, D)."""
    B, D = z_i.shape
    tb = _pick_block_rows(B)
    nb = B // tb

    kernel = functools.partial(_contrastive_loss2_kernel,
                               inv_tau=float(1.0 / tau),
                               use_softplus=use_softplus,
                               tb=tb)

    # VMEM budget: the two resident (B, D) operands (counted double-buffered to
    # be safe), ~8 live (tb, B) f32 temporaries (tile-padded), scratches, slack.
    d_pad = ((max(D, 128) + 127) // 128) * 128
    b_lane = ((max(B, 128) + 127) // 128) * 128
    b_sub = ((B + 7) // 8) * 8
    vmem_bytes = 4 * (2 * 2 * b_sub * d_pad + 8 * tb * b_lane + 8 * b_lane + 8 * 128)
    vmem_bytes = int(min(max(vmem_bytes + (2 << 20), 16 << 20), 96 << 20))

    out = pl.pallas_call(
        kernel,
        out_shape=jax.ShapeDtypeStruct((1, 128), jnp.float32),
        grid_spec=pltpu.PrefetchScalarGridSpec(
            num_scalar_prefetch=0,
            grid=(nb,),
            in_specs=[
                pl.BlockSpec((B, D), lambda r: (0, 0)),   # z_i (resident, fetched once)
                pl.BlockSpec((B, D), lambda r: (0, 0)),   # z_j (resident, fetched once)
            ],
            out_specs=pl.BlockSpec((1, 128), lambda r: (0, 0)),
            scratch_shapes=[
                pltpu.VMEM((1, 1), jnp.float32),   # running scalar accumulator
                pltpu.VMEM((1, B), jnp.float32),   # ||z_j||^2 row vector
            ],
        ),
        compiler_params=pltpu.CompilerParams(
            # row-block axis is a sequential reduction into the accumulator
            dimension_semantics=("arbitrary",),
            vmem_limit_bytes=vmem_bytes,
        ),
    )(z_i, z_j)

    loss = out[0, 0]
    # neg_sim_i == neg_sim_j in the reference, so both directions are identical.
    return {"loss": loss, "loss_e2t": loss, "loss_t2e": loss}


def _reference(z_i, z_j, tau=0.07, use_softplus=True):
    # Plain-JAX transcription of the PyTorch module for correctness checking.
    eps = 1e-8
    zi = z_i.astype(jnp.float32)
    zj = z_j.astype(jnp.float32)
    n1 = jnp.sqrt(jnp.sum(zi * zi, -1))
    n2 = jnp.sqrt(jnp.sum(zj * zj, -1))
    pos = jnp.sum(zi * zj, -1) / jnp.maximum(n1 * n2, eps) / tau
    sim = (zi @ zj.T) / jnp.maximum(n1[:, None] * n2[None, :], eps) / tau
    B = zi.shape[0]
    mask = jnp.tril(jnp.ones((B, B), bool), k=-1)
    neg = jnp.where(mask, sim, 0.0)
    expp = jnp.exp(pos)
    if use_softplus:
        term = jnp.sum(jnp.mean(jnp.logaddexp(0.0, neg), axis=1))
        loss = jnp.mean(-jnp.log(expp / (expp + term)))
    else:
        p = jax.nn.softmax(neg, axis=1)
        loss = jnp.mean(-jnp.log(expp / (expp + jnp.sum(p, axis=1))))
    return {"loss": loss, "loss_e2t": loss, "loss_t2e": loss}


if __name__ == "__main__":
    key = jax.random.PRNGKey(0)
    k1, k2 = jax.random.split(key)
    B, D = 8, 32
    z_i = jax.random.normal(k1, (B, D), dtype=jnp.float32)
    z_j = jax.random.normal(k2, (B, D), dtype=jnp.float32)

    for use_softplus in (True, False):
        out = contrastive_loss2(z_i, z_j, tau=0.07, use_softplus=use_softplus)
        jax.block_until_ready(out["loss"])
        ref = _reference(z_i, z_j, tau=0.07, use_softplus=use_softplus)
        for k in ("loss", "loss_e2t", "loss_t2e"):
            assert jnp.allclose(out[k], ref[k], rtol=2e-5, atol=2e-5), (
                use_softplus, k, out[k], ref[k])

    print("KERNEL_OK")
</pallas_src>

<mosaic_0001>
module attributes {stable_mosaic.version = 11 : i64} {
  func.func @_contrastive_loss2_kernel(%arg0: i32, %arg1: memref<8x32xf32, #tpu.memory_space<vmem>>, %arg2: memref<8x32xf32, #tpu.memory_space<vmem>>, %arg3: memref<1x128xf32, #tpu.memory_space<vmem>>, %arg4: memref<1x1xf32, #tpu.memory_space<vmem>>, %arg5: memref<1x8xf32, #tpu.memory_space<vmem>>) attributes {dimension_semantics = [#tpu.dimension_semantics<arbitrary>], iteration_bounds = array<i64: 1>, scalar_prefetch = 0 : i64, scratch_operands = 2 : i64, tpu.core_type = #tpu.core_type<tc>, window_params = [{pipeline_mode = #tpu.pipeline_mode<synchronous>, transform_indices = @transform_0, window_bounds = array<i64: 8, 32>}, {pipeline_mode = #tpu.pipeline_mode<synchronous>, transform_indices = @transform_1, window_bounds = array<i64: 8, 32>}, {pipeline_mode = #tpu.pipeline_mode<synchronous>, transform_indices = @transform_2, window_bounds = array<i64: 1, 128>}]} {
    %c0_i32 = arith.constant 0 : i32
    %0 = arith.cmpi eq, %arg0, %c0_i32 : i32
    %1 = arith.extui %0 : i1 to i32
    %c0_i32_0 = arith.constant 0 : i32
    %2 = arith.cmpi ne, %1, %c0_i32_0 : i32
    scf.if %2 {
      %cst_20 = arith.constant 0.000000e+00 : f32
      %51 = vector.broadcast %cst_20 : f32 to vector<1x1xf32>
      %c0_21 = arith.constant 0 : index
      %c0_22 = arith.constant 0 : index
      %52 = vector.load %arg4[%c0_21, %c0_22] : memref<1x1xf32, #tpu.memory_space<vmem>>, vector<1x1xf32>
      tpu.vector_store %arg4[%c0_21, %c0_22], %51 {strides = array<i32>} : memref<1x1xf32, #tpu.memory_space<vmem>>, vector<1x1xf32>,
      %c0_23 = arith.constant 0 : index
      %c0_24 = arith.constant 0 : index
      %53 = vector.load %arg2[%c0_23, %c0_24] : memref<8x32xf32, #tpu.memory_space<vmem>>, vector<8x32xf32>
      %cst_25 = arith.constant 1.000000e+00 : f32
      %54 = vector.broadcast %cst_25 : f32 to vector<1x32xf32>
      %55 = arith.mulf %53, %53 : vector<8x32xf32>
      %cst_26 = arith.constant dense<0.000000e+00> : vector<1x8xf32>
      %56 = tpu.matmul %54, %55, %cst_26 {dimension_numbers = #tpu.dot_dimension_numbers<[1], [1], [0], [0], [0, 0, 1, 0], [], []>} : vector<1x32xf32>, vector<8x32xf32>, vector<1x8xf32> -> vector<1x8xf32>
      %c0_27 = arith.constant 0 : index
      %c0_28 = arith.constant 0 : index
      %57 = vector.load %arg5[%c0_27, %c0_28] : memref<1x8xf32, #tpu.memory_space<vmem>>, vector<1x8xf32>
      tpu.vector_store %arg5[%c0_27, %c0_28], %56 {strides = array<i32>} : memref<1x8xf32, #tpu.memory_space<vmem>>, vector<1x8xf32>,
    } else {
    }
    %c8_i32 = arith.constant 8 : i32
    %3 = arith.muli %arg0, %c8_i32 : i32
    %4 = tpu.assume_multiple %3, 8 : i32
    %5 = arith.index_cast %4 : i32 to index
    %c0 = arith.constant 0 : index
    %6 = vector.load %arg1[%5, %c0] : memref<8x32xf32, #tpu.memory_space<vmem>>, vector<8x32xf32>
    %c0_1 = arith.constant 0 : index
    %c0_2 = arith.constant 0 : index
    %7 = vector.load %arg2[%c0_1, %c0_2] : memref<8x32xf32, #tpu.memory_space<vmem>>, vector<8x32xf32>
    %cst = arith.constant dense<0.000000e+00> : vector<8x8xf32>
    %8 = tpu.matmul %6, %7, %cst {dimension_numbers = #tpu.dot_dimension_numbers<[1], [1], [0], [0], [0, 0, 1, 0], [], []>} : vector<8x32xf32>, vector<8x32xf32>, vector<8x8xf32> -> vector<8x8xf32>
    %9 = arith.mulf %6, %6 : vector<8x32xf32>
    %cst_3 = arith.constant dense<0.000000e+00> : vector<8xf32>
    %10 = vector.multi_reduction <add>, %9, %cst_3 [1] : vector<8x32xf32> to vector<8xf32>
    %11 = vector.shape_cast %10 : vector<8xf32> to vector<8x1xf32>
    %c0_4 = arith.constant 0 : index
    %c0_5 = arith.constant 0 : index
    %12 = vector.load %arg5[%c0_4, %c0_5] : memref<1x8xf32, #tpu.memory_space<vmem>>, vector<1x8xf32>
    %13 = vector.broadcast %11 : vector<8x1xf32> to vector<8x8xf32>
    %14 = vector.broadcast %12 : vector<1x8xf32> to vector<8x8xf32>
    %15 = arith.mulf %13, %14 : vector<8x8xf32>
    %cst_6 = arith.constant 1.000000e-16 : f32
    %16 = vector.broadcast %cst_6 : f32 to vector<8x8xf32>
    %17 = arith.maximumf %15, %16 : vector<8x8xf32>
    %18 = math.rsqrt %17 : vector<8x8xf32>
    %19 = arith.mulf %8, %18 : vector<8x8xf32>
    %cst_7 = arith.constant 14.2857141 : f32
    %20 = vector.broadcast %cst_7 : f32 to vector<8x8xf32>
    %21 = arith.mulf %19, %20 : vector<8x8xf32>
    %c8_i32_8 = arith.constant 8 : i32
    %22 = arith.muli %arg0, %c8_i32_8 : i32
    %23 = tpu.iota {dimensions = array<i32: 0>} : vector<8x8xi32>
    %24 = vector.broadcast %22 : i32 to vector<8x8xi32>
    %25 = arith.addi %24, %23 : vector<8x8xi32>
    %26 = tpu.iota {dimensions = array<i32: 1>} : vector<8x8xi32>
    %27 = arith.cmpi sgt, %25, %26 : vector<8x8xi32>
    %cst_9 = arith.constant 0.000000e+00 : f32
    %28 = vector.broadcast %cst_9 : f32 to vector<8x8xf32>
    %29 = arith.maximumf %21, %28 : vector<8x8xf32>
    %30 = math.absf %21 : vector<8x8xf32>
    %cst_10 = arith.constant 0.000000e+00 : f32
    %31 = vector.broadcast %cst_10 : f32 to vector<8x8xf32>
    %32 = arith.subf %31, %30 : vector<8x8xf32>
    %33 = math.exp %32 : vector<8x8xf32>
    %cst_11 = arith.constant 1.000000e+00 : f32
    %34 = vector.broadcast %cst_11 : f32 to vector<8x8xf32>
    %35 = arith.addf %34, %33 : vector<8x8xf32>
    %36 = math.log %35 : vector<8x8xf32>
    %37 = arith.addf %29, %36 : vector<8x8xf32>
    %c0_12 = arith.constant 0 : index
    %c0_13 = arith.constant 0 : index
    %38 = vector.load %arg4[%c0_12, %c0_13] : memref<1x1xf32, #tpu.memory_space<vmem>>, vector<1x1xf32>
    %cst_14 = arith.constant 0.693147182 : f32
    %39 = vector.broadcast %cst_14 : f32 to vector<8x8xf32>
    %40 = arith.select %27, %37, %39 : vector<8x8xi1>, vector<8x8xf32>
    %41 = vector.shape_cast %40 : vector<8x8xf32> to vector<1x8x8xf32>
    %cst_15 = arith.constant dense<0.000000e+00> : vector<1xf32>
    %42 = vector.multi_reduction <add>, %41, %cst_15 [1, 2] : vector<1x8x8xf32> to vector<1xf32>
    %43 = vector.shape_cast %42 : vector<1xf32> to vector<1x1x1xf32>
    %44 = vector.extract %43[0, 0, 0] : f32 from vector<1x1x1xf32>
    %45 = vector.broadcast %44 : f32 to vector<1x1xf32>
    %46 = arith.addf %38, %45 : vector<1x1xf32>
    %c0_16 = arith.constant 0 : index
    %c0_17 = arith.constant 0 : index
    %47 = vector.load %arg4[%c0_16, %c0_17] : memref<1x1xf32, #tpu.memory_space<vmem>>, vector<1x1xf32>
    tpu.vector_store %arg4[%c0_16, %c0_17], %46 {strides = array<i32>} : memref<1x1xf32, #tpu.memory_space<vmem>>, vector<1x1xf32>,
    %c0_i32_18 = arith.constant 0 : i32
    %48 = arith.cmpi eq, %arg0, %c0_i32_18 : i32
    %49 = arith.extui %48 : i1 to i32
    %c0_i32_19 = arith.constant 0 : i32
    %50 = arith.cmpi ne, %49, %c0_i32_19 : i32
    scf.if %50 {
      %c0_20 = arith.constant 0 : index
      %c0_21 = arith.constant 0 : index
      %51 = vector.load %arg1[%c0_20, %c0_21] : memref<8x32xf32, #tpu.memory_space<vmem>>, vector<8x32xf32>
      %c0_22 = arith.constant 0 : index
      %c0_23 = arith.constant 0 : index
      %52 = vector.load %arg2[%c0_22, %c0_23] : memref<8x32xf32, #tpu.memory_space<vmem>>, vector<8x32xf32>
      %53 = arith.mulf %51, %51 : vector<8x32xf32>
      %cst_24 = arith.constant dense<0.000000e+00> : vector<8xf32>
      %54 = vector.multi_reduction <add>, %53, %cst_24 [1] : vector<8x32xf32> to vector<8xf32>
      %55 = vector.shape_cast %54 : vector<8xf32> to vector<8x1xf32>
      %56 = arith.mulf %52, %52 : vector<8x32xf32>
      %cst_25 = arith.constant dense<0.000000e+00> : vector<8xf32>
      %57 = vector.multi_reduction <add>, %56, %cst_25 [1] : vector<8x32xf32> to vector<8xf32>
      %58 = vector.shape_cast %57 : vector<8xf32> to vector<8x1xf32>
      %59 = arith.mulf %51, %52 : vector<8x32xf32>
      %cst_26 = arith.constant dense<0.000000e+00> : vector<8xf32>
      %60 = vector.multi_reduction <add>, %59, %cst_26 [1] : vector<8x32xf32> to vector<8xf32>
      %61 = vector.shape_cast %60 : vector<8xf32> to vector<8x1xf32>
      %62 = arith.mulf %55, %58 : vector<8x1xf32>
      %cst_27 = arith.constant 1.000000e-16 : f32
      %63 = vector.broadcast %cst_27 : f32 to vector<8x1xf32>
      %64 = arith.maximumf %62, %63 : vector<8x1xf32>
      %65 = math.rsqrt %64 : vector<8x1xf32>
      %66 = arith.mulf %61, %65 : vector<8x1xf32>
      %cst_28 = arith.constant 14.2857141 : f32
      %67 = vector.broadcast %cst_28 : f32 to vector<8x1xf32>
      %68 = arith.mulf %66, %67 : vector<8x1xf32>
      %69 = math.exp %68 : vector<8x1xf32>
      %c0_29 = arith.constant 0 : index
      %c0_30 = arith.constant 0 : index
      %70 = vector.load %arg4[%c0_29, %c0_30] : memref<1x1xf32, #tpu.memory_space<vmem>>, vector<1x1xf32>
      %cst_31 = arith.constant 1.250000e-01 : f32
      %71 = vector.broadcast %cst_31 : f32 to vector<1x1xf32>
      %72 = arith.mulf %70, %71 : vector<1x1xf32>
      %73 = vector.broadcast %72 : vector<1x1xf32> to vector<8x1xf32>
      %74 = arith.addf %69, %73 : vector<8x1xf32>
      %75 = arith.divf %69, %74 : vector<8x1xf32>
      %76 = math.log %75 : vector<8x1xf32>
      %cst_32 = arith.constant 0.000000e+00 : f32
      %77 = vector.broadcast %cst_32 : f32 to vector<8x1xf32>
      %78 = arith.subf %77, %76 : vector<8x1xf32>
      %79 = vector.shape_cast %78 : vector<8x1xf32> to vector<1x8x1xf32>
      %cst_33 = arith.constant dense<0.000000e+00> : vector<1xf32>
      %80 = vector.multi_reduction <add>, %79, %cst_33 [1, 2] : vector<1x8x1xf32> to vector<1xf32>
      %81 = vector.shape_cast %80 : vector<1xf32> to vector<1x1x1xf32>
      %82 = vector.extract %81[0, 0, 0] : f32 from vector<1x1x1xf32>
      %83 = vector.broadcast %82 : f32 to vector<1x1xf32>
      %cst_34 = arith.constant 1.250000e-01 : f32
      %84 = vector.broadcast %cst_34 : f32 to vector<1x1xf32>
      %85 = arith.mulf %83, %84 : vector<1x1xf32>
      %86 = vector.shape_cast %85 : vector<1x1xf32> to vector<1x1xf32>
      %87 = vector.broadcast %86 : vector<1x1xf32> to vector<1x128xf32>
      %c0_35 = arith.constant 0 : index
      %c0_36 = arith.constant 0 : index
      %88 = vector.load %arg3[%c0_35, %c0_36] : memref<1x128xf32, #tpu.memory_space<vmem>>, vector<1x128xf32>
      tpu.vector_store %arg3[%c0_35, %c0_36], %87 {strides = array<i32>} : memref<1x128xf32, #tpu.memory_space<vmem>>, vector<1x128xf32>,
    } else {
    }
    return
  }
  func.func @transform_0(%arg0: i32) -> (i32, i32) {
    %c0_i32 = arith.constant 0 : i32
    %c0_i32_0 = arith.constant 0 : i32
    %c0_i32_1 = arith.constant 0 : i32
    return %c0_i32, %c0_i32_0 : i32, i32
  }
  func.func @transform_1(%arg0: i32) -> (i32, i32) {
    %c0_i32 = arith.constant 0 : i32
    %c0_i32_0 = arith.constant 0 : i32
    %c0_i32_1 = arith.constant 0 : i32
    return %c0_i32, %c0_i32_0 : i32, i32
  }
  func.func @transform_2(%arg0: i32) -> (i32, i32) {
    %c0_i32 = arith.constant 0 : i32
    %c0_i32_0 = arith.constant 0 : i32
    %c0_i32_1 = arith.constant 0 : i32
    return %c0_i32, %c0_i32_0 : i32, i32
  }
}

</mosaic_0001>

<bundles_post_ra>
// kernel: tpu_custom_call.1
= control target key start
LH: loop header
LB: loop body
LE: loop exit
PB: predicated region body
PF: predicated region fallthrough
CT: control target
= control target key end

     0   :  { %7 = vsyncpa [#allocation5], 0  ;;  %s502_s0 = inlined_call_operand.hbm [shape: f32[8,32], index: 0, kind: input, shape index: {}]   ;;  %s503_s1 = inlined_call_operand.hbm [shape: f32[8,32], index: 1, kind: input, shape index: {}]   ;;  %s504_s2 = inlined_call_operand.hbm [shape: f32[1,128], index: 2, kind: output, shape index: {}]  }
   0x1   :  { %8 = vsyncpa [#allocation8], 0 }
   0x2   :  { %9 = vsyncpa [#allocation6], 0  ;;  %s436_s9 = smov [#allocation4]   ;;  %s437_s11 = smov [#allocation7]  }
   0x3   :  { %s16_s10 = sshll.u32 %s436_s9, 4  ;;  %s26_s12 = sshll.u32 %s437_s11, 4  ;;  %s17_s10 = int_to_ptr.vmem [resolvable:$true] %s16_s10  ;;  %s27_s12 = int_to_ptr.vmem [resolvable:$true] %s26_s12 }
   0x4   :  { %s364_s15 = scalar_lea.hbm %s502_s0, 128 }
   0x5   :  { %p365_p0 = scmp.ne.s32.totalorder %s502_s0, %s364_s15  ;;  %p368_p1 = scmp.lt.u32.totalorder %s364_s15, %s502_s0 }
   0x7   :  { %p370_p2 = pnand %p368_p1, %p365_p0 }
   0x9   :  { %373 = shalt.err (!%p370_p2)
}
   0xa   :  { %s374_s20 = scalar_lea.vmem %s17_s10, 128  ;;  %p379_p4 = scmp.lt.s32.totalorder %s17_s10, %s17_s10 }
   0xb   :  { %p375_p3 = scmp.ne.s32.totalorder %s17_s10, %s374_s20  ;;  %p380_p5 = scmp.lt.s32.totalorder %s374_s20, %s374_s20 }
   0xd   :  { %p381_p6 = por %p380_p5, %p379_p4 }
   0xf   :  { %p382_p7 = pnand %p381_p6, %p375_p3 }
  0x11   :  { %385 = shalt.err (!%p382_p7)
}
  0x12   :  { %19 = dma.hbm_to_vmem [thread:$0]  %s502_s0, 128, %s17_s10, [#allocation5]  }
  0x13   :  { %s386_s25 = scalar_lea.hbm %s503_s1, 128 }
  0x14   :  { %p387_p8 = scmp.ne.s32.totalorder %s503_s1, %s386_s25  ;;  %p390_p9 = scmp.lt.u32.totalorder %s386_s25, %s503_s1 }
  0x16   :  { %p392_p10 = pnand %p390_p9, %p387_p8 }
  0x18   :  { %395 = shalt.err (!%p392_p10)
}
  0x19   :  { %s396_s30 = scalar_lea.vmem %s27_s12, 128  ;;  %p401_p12 = scmp.lt.s32.totalorder %s27_s12, %s27_s12 }
  0x1a   :  { %p397_p11 = scmp.ne.s32.totalorder %s27_s12, %s396_s30  ;;  %p402_p13 = scmp.lt.s32.totalorder %s396_s30, %s396_s30 }
  0x1c   :  { %p403_p0 = por %p402_p13, %p401_p12 }
  0x1e   :  { %p404_p1 = pnand %p403_p0, %p397_p11 }
  0x20   :  { %407 = shalt.err (!%p404_p1)
}
  0x21   :  { %29 = dma.hbm_to_vmem [thread:$0]  %s503_s1, 128, %s27_s12, [#allocation8]  }
  0x22   :  { %430 = dma.done.wait [#allocation5], 128  }
  0x23   :  { %431 = vsyncadd [#allocation5], 4294967168 }
  0x24   :  { %432 = dma.done.wait [#allocation8], 128  }
  0x25   :  { %433 = vsyncadd [#allocation8], 4294967168  ;;  %vm40_vm0 = vcmask 0   ;;  %v438_v0 = vmov 0.0   ;;  %vm439_vm1 = vmmov 0   ;;  %v42_v1 = vld [vmem:[#allocation7] sm:$0xff]  ;;  %v220_v24 = vlaneseq }
  0x26   :  { %41 = vst.msk [vmem:[#allocation2] sm:$0x1] %vm40_vm0, %v438_v0  ;;  %330 = vmatprep.subr.mxu0 %v438_v0  ;;  %332 = vmatprep.mubr.msk.f32.mxu0 %vm439_vm1, %v438_v0  ;;  %vm44_vm2 = vcmask 261120   ;;  %v125_v2 = vld [vmem:[#allocation4] sm:$0xff]  ;;  %v43_v3 = vmul.f32 %v42_v1, %v42_v1  ;;  %v440_v6 = vmov 1.0   ;;  %vm121_vm3 = vcmask 57344  }
  0x27   :  { %335 = vmatprep.subr.mxu1 %v438_v0  ;;  %337 = vmatprep.mubr.msk.f32.mxu1 %vm439_vm1, %v438_v0  ;;  %v204_v4 = vmul.f32 %v125_v2, %v125_v2  ;;  %v221_v25 = vshrl.u32 %v220_v24, 7  ;;  %v225_v26 = vand.u32 127, %v220_v24  ;;  %vm238_vm5 = vcmask 64512   ;;  %s441_s4 = smov [#allocation9]  }
  0x28   :  { %336 = vmatpush3.xpose.msk.msra.mxu1 %vm44_vm2, %v42_v1  ;;  %331 = vmatpush3.xpose.msk.msra.mxu0 %vm44_vm2, %v43_v3  ;;  %v263_v7 = vsel %vm44_vm2, %v43_v3, 0.0  ;;  %v266_v31 = vmul.f32 %v125_v2, %v42_v1  ;;  %vm291_vm6 = vcmask 7168   ;;  %s311_s5 = sshll.u32 %s441_s4, 4  ;;  %s312_s5 = int_to_ptr.vmem [resolvable:$true] %s311_s5 }
  0x29   :  { %v205_v5 = vsel %vm44_vm2, %v204_v4, 0.0  ;;  %vm226_vm4 = vcmp.gt.s32.totalorder %v221_v25, %v225_v26  ;;  %v282_v54 = vsub.s32 0, %v221_v25  ;;  %s408_s7 = scalar_lea.vmem %s312_s5, 16  ;;  %s412_s8 = scalar_lea.vmem %s312_s5, 32 }
  0x2a   :  { %206 = vadd.xlane.f32.xlu0 %v205_v5  ;;  %260 = vadd.xlane.f32.xlu1 %v205_v5  ;;  %v267_v34 = vsel %vm44_vm2, %v266_v31, 0.0  ;;  %p409_p2 = scmp.ne.s32.totalorder %s312_s5, %s408_s7  ;;  %p413_p3 = scmp.lt.s32.totalorder %s312_s5, %s312_s5 }
  0x2b   :  { %338 = vmatmul.mubr.msk.f32.vlgmr.msra.gmra.mrb[0].mxu1 %vm44_vm2, %v125_v2  ;;  %333 = vmatmul.mubr.msk.f32.vlgmr.msra.gmra.mrb[0].mxu0 %vm44_vm2, %v440_v6  ;;  %p414_p4 = scmp.lt.s32.totalorder %s412_s8, %s408_s7 }
  0x2d   :  { %v236_v50 = vld [vmem:[#allocation2] sm:$0x1]  ;;  %p415_p5 = por %p414_p4, %p413_p3 }
  0x2e   :  { %264 = vadd.xlane.f32.xlu1 %v263_v7 }
  0x2f   :  { %p416_p6 = pnand %p415_p5, %p409_p2 }
  0xb7   :  { %v207_v12 = vpop.xlane.xlu0 %206  ;;  %v261_v42 = vpop.xlane.xlu1 %260 }
  0xbb   :  { %v265_v43 = vpop.xlane.xlu1 %264 }
  0xbc   :  { %v270_v44 = vmul.f32 %v265_v43, %v261_v42 }
  0xbe   :  { %v271_v45 = vmax.f32 %v270_v44, 1e-16 }
  0xfe   :  { %v200_v8 = vpop.f32.mrb[0].mxu1  ;;  %v117_v10 = vpop.f32.mrb[0].mxu0 }
  0xff   :  { %v339_v9 = vpop.f32.mrb[1].mxu1  ;;  %122 = vst.msk [vmem:[#allocation3] sm:$0x1] %vm121_vm3, %v117_v10  ;;  %v334_v11 = vpop.f32.mrb[1].mxu0 }
 0x106   :  { %v325_v13 = vld [vmem:[#allocation3] ss:$0 sm:$0xff] }
 0x107   :  { %v215_v14 = vmul.f32 %v325_v13, %v207_v12 }
 0x109   :  { %v216_v15 = vmax.f32 %v215_v14, 1e-16 }
 0x10b   :  { %350 = vrsqrt.f32 %v216_v15 }
 0x115   :  { %v351_v16 = vpop.eup %350 }
 0x116   :  { %v218_v17 = vmul.f32 %v351_v16, %v200_v8 }
 0x118   :  { %v219_v18 = vmul.f32 14.285714, %v218_v17 }
 0x11a   :  { %v228_v19 = vand.u32 2147483647, %v219_v18  ;;  %v227_v28 = vmax.f32 %v219_v18, 0.0 }
 0x11c   :  { %v229_v20 = vsub.f32 0.0, %v228_v19 }
 0x11e   :  { %v230_v21 = vmul.f32 1.442695, %v229_v20 }
 0x120   :  { %352 = vpow2.f32 %v230_v21 }
 0x12a   :  { %v353_v22 = vpop.eup %352 }
 0x12b   :  { %v232_v23 = vadd.f32 1.0, %v353_v22 }
 0x12d   :  { %354 = vlog2.f32 %v232_v23 }
 0x12e   :  { %356 = vrsqrt.f32 %v271_v45 }
 0x137   :  { %v355_v27 = vpop.eup %354 }
 0x138   :  { %v234_v29 = vmul.f32 0.6931472, %v355_v27  ;;  %v357_v46 = vpop.eup %356 }
 0x13a   :  { %v235_v30 = vadd.f32 %v234_v29, %v227_v28 }
 0x13c   :  { %v237_v32 = vsel %vm226_vm4, %v235_v30, 0.6931472 }
 0x13d   :  { %v239_v33 = vsel %vm238_vm5, %v237_v32, 0.0 }
 0x13e   :  { %240 = vadd.xlane.f32.xlu0 %v239_v33 }
 0x142   :  { %268 = vadd.xlane.f32.xlu0 %v267_v34 }
 0x1cb   :  { %v241_v35 = vpop.xlane.xlu0 %240 }
 0x1cc   :  { %v242_v36 = vrot.slane %v241_v35, 4 }
 0x1ce   :  { %v243_v37 = vadd.f32 %v242_v36, %v241_v35 }
 0x1cf   :  { %v269_v47 = vpop.xlane.xlu0 %268 }
 0x1d0   :  { %v244_v38 = vrot.slane %v243_v37, 2  ;;  %v273_v48 = vmul.f32 %v357_v46, %v269_v47 }
 0x1d2   :  { %v245_v39 = vadd.f32 %v244_v38, %v243_v37  ;;  %v274_v49 = vmul.f32 14.285714, %v273_v48 }
 0x1d4   :  { %v246_v40 = vrot.slane %v245_v39, 1  ;;  %v275_v51 = vmul.f32 1.442695, %v274_v49 }
 0x1d6   :  { %v247_v41 = vadd.f32 %v246_v40, %v245_v39  ;;  %358 = vpow2.f32 %v275_v51 }
 0x1d8   :  { %340 = vpush %v247_v41 }
 0x1e0   :  { %v359_v58 = vpop.eup %358 }
 0x209   :  { %s341_s1 = spop %340 }
 0x20a   :  { %v249_v52 = vstv %s341_s1 }
 0x20b   :  { %v250_v53 = vadd.f32 %v249_v52, %v236_v50 }
 0x20d   :  { %252 = vst.msk [vmem:[#allocation2] sm:$0x1] %vm40_vm0, %v250_v53 }
 0x214   :  { %v277_v55 = vld [vmem:[#allocation2] sm:$0x1] }
 0x215   :  { %v278_v56 = vmul.f32 0.125, %v277_v55 }
 0x217   :  { %v283_v57 = vrot.slane %v278_v56, %v282_v54 }
 0x219   :  { %v285_v59 = vadd.f32 %v359_v58, %v283_v57 }
 0x21b   :  { %360 = vrcp.f32 %v285_v59 }
 0x225   :  { %v361_v60 = vpop.eup %360 }
 0x226   :  { %v287_v61 = vmul.f32 %v361_v60, %v359_v58 }
 0x228   :  { %362 = vlog2.f32 %v287_v61 }
 0x232   :  { %v363_v62 = vpop.eup %362 }
 0x233   :  { %v289_v63 = vmul.f32 0.6931472, %v363_v62 }
 0x235   :  { %v290_v0 = vsub.f32 0.0, %v289_v63 }
 0x237   :  { %v292_v1 = vsel %vm291_vm6, %v290_v0, 0.0 }
 0x238   :  { %293 = vadd.xlane.f32.xlu1 %v292_v1 }
 0x2c5   :  { %v294_v2 = vpop.xlane.xlu1 %293 }
 0x2c6   :  { %v295_v3 = vrot.slane %v294_v2, 4 }
 0x2c8   :  { %v296_v4 = vadd.f32 %v295_v3, %v294_v2 }
 0x2ca   :  { %v297_v5 = vrot.slane %v296_v4, 2 }
 0x2cc   :  { %v298_v6 = vadd.f32 %v297_v5, %v296_v4 }
 0x2ce   :  { %v299_v7 = vrot.slane %v298_v6, 1 }
 0x2d0   :  { %v300_v8 = vadd.f32 %v299_v7, %v298_v6 }
 0x2d2   :  { %342 = vpush %v300_v8 }
 0x303   :  { %s343_s6 = spop %342 }
 0x304   :  { %v302_v9 = vstv %s343_s6 }
 0x305   :  { %v303_v10 = vmul.f32 0.125, %v302_v9 }
 0x307   :  { %304 = vst [vmem:[#allocation9] sm:$0x1] %v303_v10 }
 0x308   :  { %419 = shalt.err (!%p416_p6)
}
 0x309   :  { %s420_s11 = scalar_lea.hbm %s504_s2, 16 }
 0x30a   :  { %p421_p7 = scmp.ne.s32.totalorder %s504_s2, %s420_s11  ;;  %p424_p8 = scmp.lt.u32.totalorder %s420_s11, %s504_s2 }
 0x30c   :  { %p426_p9 = pnand %p424_p8, %p421_p7 }
 0x30e   :  { %429 = shalt.err (!%p426_p9)
}
 0x30f   :  { %314 = dma.vmem_to_hbm [thread:$0]  %s312_s5, 16, %s504_s2, [#allocation6]  }
 0x310   :  { %434 = dma.done.wait [#allocation6], 16  }
 0x311   :  { %435 = vsyncadd [#allocation6], 4294967280 }
 0x312   :  { %318 = vsyncpa [#allocation5], 1 }
 0x313   :  { %319 = vsyncpa [#allocation8], 1 }
 0x314   :  { %320 = vsyncpa [#allocation6], 1 }

</bundles_post_ra>
